<compile_context>
chip_gen: v6e
topology: v6e:2x2x1
jax: 0.10.0
libtpu: 0.0.40
codegen_flags: <defaults>
</compile_context>

<pallas_src>
import jax
import jax.numpy as jnp
from jax.experimental import pallas as pl
from jax.experimental.pallas import tpu as pltpu

_LANE = 128
_SUBLANE = 8
_TILE_VMEM_BUDGET = 16 * 1024 * 1024   # bytes for all double-buffered tiles
_VMEM_LIMIT_BYTES = 32 * 1024 * 1024   # scoped VMEM request (safe on v5e/v6e/v7x)


def _pos_embed_kernel(w_ref, o_ref):
    # w_ref: (TS, TD) tile of W_pos[:seq]
    # o_ref: (TB, TS, TD) tile of the output (batch folded into the block)
    o_ref[...] = jnp.broadcast_to(w_ref[...][None, :, :], o_ref.shape)


def _choose_tiles(batch, seq_len, d_model, itemsize):
    """Pick (TB, TS, TD) so 2x input + 2x output buffers fit the VMEM budget."""
    # Lane tile: multiple of 128 when possible, else the full dim (satisfies the
    # "divisible by 128 OR equal to full array dim" block rule).
    if d_model % _LANE == 0:
        td = min(d_model, 2048)
    else:
        td = d_model
    # Seq tile: multiple of 8, or the full seq when it is small.
    ts = seq_len if seq_len <= 512 else 512

    def fits(tb, ts, td):
        in_buf = 2 * ts * td * itemsize            # double-buffered W_pos tile
        out_buf = 2 * tb * ts * td * itemsize      # double-buffered output tile
        return in_buf + out_buf <= _TILE_VMEM_BUDGET

    # Fold as much of batch into the block as the budget allows.
    tb = batch
    while tb > 1 and not fits(tb, ts, td):
        tb = (tb + 1) // 2
    # If a single batch row still doesn't fit, shrink the seq tile.
    while ts > _SUBLANE and not fits(tb, ts, td):
        ts = max(_SUBLANE, ((ts // 2) // _SUBLANE) * _SUBLANE)
    return tb, ts, td


def pos_embed(tokens: jax.Array, w_pos: jax.Array) -> jax.Array:
    """tokens: int32[batch, seq]; w_pos: f32[n_ctx, d_model] -> f32[batch, seq, d_model]"""
    batch, seq_len = tokens.shape
    n_ctx, d_model = w_pos.shape
    assert seq_len <= n_ctx

    # Glue: static slice of the positional table (seq_len is a static shape).
    w_slice = w_pos[:seq_len]  # (seq, d_model)
    itemsize = jnp.dtype(w_pos.dtype).itemsize

    tb, ts, td = _choose_tiles(batch, seq_len, d_model, itemsize)
    grid = (pl.cdiv(seq_len, ts), pl.cdiv(d_model, td), pl.cdiv(batch, tb))

    # Pure HBM-write roofline: batch*seq*d stored + seq*d read.
    cost = pl.CostEstimate(
        flops=0,
        transcendentals=0,
        bytes_accessed=(batch * seq_len * d_model + seq_len * d_model) * itemsize,
    )

    # NOTE: if d_model is not a multiple of 128 (test config d_model=32), the
    # output stores are masked partial stores; the real config (d_model=768)
    # stays on the lane-dense path.
    return pl.pallas_call(
        _pos_embed_kernel,
        out_shape=jax.ShapeDtypeStruct((batch, seq_len, d_model), w_pos.dtype),
        grid_spec=pltpu.PrefetchScalarGridSpec(
            num_scalar_prefetch=0,
            grid=grid,
            in_specs=[
                # Batch-tile axis is innermost, so this block index repeats and
                # the re-DMA of the W_pos tile is skipped across batch steps.
                pl.BlockSpec((ts, td), lambda s, d, b: (s, d)),
            ],
            out_specs=pl.BlockSpec((tb, ts, td), lambda s, d, b: (b, s, d)),
        ),
        compiler_params=pltpu.CompilerParams(
            dimension_semantics=("parallel", "parallel", "parallel"),
            vmem_limit_bytes=_VMEM_LIMIT_BYTES,
        ),
        cost_estimate=cost,
    )(w_slice)


def pos_embed_ref(tokens: jax.Array, w_pos: jax.Array) -> jax.Array:
    batch, seq_len = tokens.shape
    return jnp.broadcast_to(w_pos[:seq_len][None], (batch, seq_len, w_pos.shape[1]))


if __name__ == "__main__":
    # Small config consistent with the module: n_ctx x d_model positional table.
    batch, seq_len = 2, 8
    n_ctx, d_model = 64, 32
    d_vocab = 128
    init_range = 0.02

    key = jax.random.PRNGKey(0)
    k_w, k_tok = jax.random.split(key)

    # Deterministic parameter init: W_pos ~ Normal(0, init_range), as in nn.init.normal_.
    w_pos = init_range * jax.random.normal(k_w, (n_ctx, d_model), dtype=jnp.float32)
    tokens = jax.random.randint(k_tok, (batch, seq_len), 0, d_vocab, dtype=jnp.int32)

    out = pos_embed(tokens, w_pos)
    out = jax.block_until_ready(out)

    expected = pos_embed_ref(tokens, w_pos)
    assert out.shape == (batch, seq_len, d_model)
    assert out.dtype == jnp.float32
    assert jnp.allclose(out, expected), "Pallas output mismatch vs reference"

    print("KERNEL_OK")
</pallas_src>

<mosaic_0001>
module attributes {stable_mosaic.version = 11 : i64} {
  func.func @_pos_embed_kernel(%arg0: i32, %arg1: i32, %arg2: i32, %arg3: memref<8x32xf32, #tpu.memory_space<vmem>>, %arg4: memref<2x8x32xf32, #tpu.memory_space<vmem>>) attributes {dimension_semantics = [#tpu.dimension_semantics<parallel>, #tpu.dimension_semantics<parallel>, #tpu.dimension_semantics<parallel>], iteration_bounds = array<i64: 1, 1, 1>, scalar_prefetch = 0 : i64, scratch_operands = 0 : i64, tpu.core_type = #tpu.core_type<tc>, window_params = [{transform_indices = @transform_0, window_bounds = array<i64: 8, 32>}, {transform_indices = @transform_1, window_bounds = array<i64: 2, 8, 32>}]} {
    %c0 = arith.constant 0 : index
    %c0_0 = arith.constant 0 : index
    %0 = vector.load %arg3[%c0, %c0_0] : memref<8x32xf32, #tpu.memory_space<vmem>>, vector<8x32xf32>
    %1 = vector.shape_cast %0 : vector<8x32xf32> to vector<1x8x32xf32>
    %2 = vector.shape_cast %1 : vector<1x8x32xf32> to vector<1x8x32xf32>
    %3 = vector.broadcast %2 : vector<1x8x32xf32> to vector<2x8x32xf32>
    %c0_1 = arith.constant 0 : index
    %c0_2 = arith.constant 0 : index
    %c0_3 = arith.constant 0 : index
    %4 = vector.load %arg4[%c0_1, %c0_2, %c0_3] : memref<2x8x32xf32, #tpu.memory_space<vmem>>, vector<2x8x32xf32>
    tpu.vector_store %arg4[%c0_1, %c0_2, %c0_3], %3 {strides = array<i32>} : memref<2x8x32xf32, #tpu.memory_space<vmem>>, vector<2x8x32xf32>,
    return
  }
  func.func @transform_0(%arg0: i32, %arg1: i32, %arg2: i32) -> (i32, i32) {
    %c0_i32 = arith.constant 0 : i32
    return %arg0, %arg1 : i32, i32
  }
  func.func @transform_1(%arg0: i32, %arg1: i32, %arg2: i32) -> (i32, i32, i32) {
    %c0_i32 = arith.constant 0 : i32
    return %arg2, %arg0, %arg1 : i32, i32, i32
  }
}

</mosaic_0001>

<bundles_post_ra>
// kernel: tpu_custom_call.1
= control target key start
LH: loop header
LB: loop body
LE: loop exit
PB: predicated region body
PF: predicated region fallthrough
CT: control target
= control target key end

     0   :  { %6 = vsyncpa [#allocation3], 0  ;;  %s110_s0 = inlined_call_operand.hbm [shape: f32[8,32], index: 0, kind: input, shape index: {}]   ;;  %s111_s1 = inlined_call_operand.hbm [shape: f32[2,8,32], index: 1, kind: output, shape index: {}]  }
   0x1   :  { %7 = vsyncpa [#allocation4], 0  ;;  %s90_s6 = smov [#allocation2]  }
   0x2   :  { %s14_s7 = sshll.u32 %s90_s6, 4  ;;  %s15_s7 = int_to_ptr.vmem [resolvable:$true] %s14_s7 }
   0x3   :  { %s54_s8 = scalar_lea.vmem %s15_s7, 128  ;;  %p59_p1 = scmp.lt.s32.totalorder %s15_s7, %s15_s7 }
   0x4   :  { %p55_p0 = scmp.ne.s32.totalorder %s15_s7, %s54_s8  ;;  %p60_p2 = scmp.lt.s32.totalorder %s54_s8, %s54_s8 }
   0x6   :  { %p61_p3 = por %p60_p2, %p59_p1 }
   0x8   :  { %p62_p4 = pnand %p61_p3, %p55_p0 }
   0xa   :  { %65 = shalt.err (!%p62_p4)
}
   0xb   :  { %17 = dma.hbm_to_vmem [thread:$0]  %s110_s0, 128, %s15_s7, [#allocation3]  }
   0xc   :  { %86 = dma.done.wait [#allocation3], 128  }
   0xd   :  { %87 = vsyncadd [#allocation3], 4294967168  ;;  %s91_s11 = smov [#allocation5]   ;;  %vm22_vm0 = vcmask 261120   ;;  %v21_v0 = vld [vmem:[#allocation2] sm:$0xff] }
   0xe   :  { %s30_s12 = sshll.u32 %s91_s11, 4  ;;  %23 = vst.msk [vmem:[#allocation5] sm:$0xff] %vm22_vm0, %v21_v0  ;;  %24 = vst.msk [vmem:[#allocation5 + $0x8] sm:$0xff] %vm22_vm0, %v21_v0  ;;  %s31_s12 = int_to_ptr.vmem [resolvable:$true] %s30_s12 }
   0xf   :  { %s66_s13 = scalar_lea.vmem %s31_s12, 256  ;;  %p71_p6 = scmp.lt.s32.totalorder %s31_s12, %s31_s12 }
  0x10   :  { %p67_p5 = scmp.ne.s32.totalorder %s31_s12, %s66_s13  ;;  %p72_p7 = scmp.lt.s32.totalorder %s66_s13, %s66_s13 }
  0x12   :  { %p73_p8 = por %p72_p7, %p71_p6 }
  0x14   :  { %p74_p9 = pnand %p73_p8, %p67_p5 }
  0x16   :  { %77 = shalt.err (!%p74_p9)
}
  0x17   :  { %s92_s14 = smov 128   ;;  %s93_s15 = smov 8  }
  0x18   :  { %36 = dma.vmem_to_hbm [thread:$0]  %s31_s12, 256, %s111_s1, [#allocation4], %s92_s14, %s92_s14, %s93_s15  }
  0x19   :  { %88 = dma.done.wait [#allocation4], 256  }
  0x1a   :  { %89 = vsyncadd [#allocation4], 4294967040 }
  0x1b   :  { %40 = vsyncpa [#allocation3], 1 }
  0x1c   :  { %41 = vsyncpa [#allocation4], 1 }

</bundles_post_ra>
